<compile_context>
chip_gen: v7x
topology: tpu7x:2x2x1
jax: 0.10.0
libtpu: 0.0.40
codegen_flags: <defaults>
</compile_context>

<pallas_src>
import functools

import jax
import jax.numpy as jnp
from jax.experimental import pallas as pl
from jax.experimental.pallas import tpu as pltpu  # noqa: F401  (TPU backend)

_KIN = 8        # 4 (x1 features) + 4 (x2 features)
_B_PAD = 8      # batch padded to one sublane tile
_NLANES = 128   # lane-dense output slab width
_SLAB_ROWS = _B_PAD + _KIN + 1   # x block (8) + fused weight (8) + bias row (1)


def actor_kernel(slab_ref, out_ref):
    # slab_ref layout (17, 128):
    #   rows  0: 8  -> x block   (rows 0..B-1 real, lanes 0:4 = x1, 4:8 = x2)
    #   rows  8:16  -> fused weight W (8, 128)
    #   row  16     -> fused bias row (1, 128)
    x = slab_ref[0:_B_PAD, :]            # (8, 128); only lanes 0:8 are nonzero
    w = slab_ref[_B_PAD:_B_PAD + _KIN, :]          # (8, 128)
    bias = slab_ref[_B_PAD + _KIN:_B_PAD + _KIN + 1, :]   # (1, 128)

    # Unrolled VPU FMA: acc[b, n] = sum_k x[b, k] * w[k, n]
    acc = x[:, 0:1] * w[0:1, :]
    for k in range(1, _KIN):
        acc = acc + x[:, k:k + 1] * w[k:k + 1, :]
    out_ref[...] = acc + bias            # sublane-broadcast bias add


def make_param_slab(w1, b1, w2, b2):
    """Precompute the (9,128) parameter slab: 8 fused-weight rows + 1 bias row.

    Call once per parameter update (NOT per forward call).
    w1: (4, 4) (in, out), b1: (1, 4); w2: (4, 1) (in, out), b2: (1, 1).
    """
    wf = jnp.zeros((_KIN, _NLANES), jnp.float32)
    wf = wf.at[0:4, 0:4].set(w1)                   # out1
    wf = wf.at[0:4, 4:8].set(2.0 * w1)             # out1 * 2 (exact: pow2 scale)
    wf = wf.at[4:8, 8:9].set(w2)                   # out2

    bias_row = jnp.zeros((1, _NLANES), jnp.float32)
    bias_row = bias_row.at[0, 0:4].set(b1.reshape(4))
    bias_row = bias_row.at[0, 4:8].set(2.0 * b1.reshape(4))
    bias_row = bias_row.at[0, 8:9].set(b2.reshape(1))

    return jnp.concatenate([wf, bias_row], axis=0)  # (9, 128)


@functools.partial(jax.jit, donate_argnums=())
def actor_forward(x1, x2, param_slab):
    """Actor.forward. Returns ((out1, out1*2), out2) == ((out, out2), res2)."""
    B = x1.shape[0]
    assert B <= _B_PAD, "this micro-kernel packs the batch into one sublane tile"

    # Pack the per-call activations: (B,8) -> zero-padded (8,128) block, then
    # stack with the precomputed parameter slab -> one (17,128) input / one DMA.
    x12 = jnp.concatenate([x1, x2], axis=1)                          # (B, 8)
    x_block = jnp.pad(x12, ((0, _B_PAD - B), (0, _NLANES - _KIN)))   # (8, 128)
    slab = jnp.concatenate([x_block, param_slab], axis=0)            # (17, 128)

    out = pl.pallas_call(
        actor_kernel,
        out_shape=jax.ShapeDtypeStruct((_B_PAD, _NLANES), jnp.float32),
        grid=(),
        in_specs=[pl.BlockSpec((_SLAB_ROWS, _NLANES), lambda: (0, 0))],
        out_specs=pl.BlockSpec((_B_PAD, _NLANES), lambda: (0, 0)),
        cost_estimate=pl.CostEstimate(
            flops=2 * _B_PAD * _KIN * _NLANES,
            transcendentals=0,
            bytes_accessed=(_SLAB_ROWS * _NLANES + _B_PAD * _NLANES) * 4,
        ),
    )(slab)

    out1 = out[:B, 0:4]
    out1x2 = out[:B, 4:8]
    out2 = out[:B, 8:9]
    return (out1, out1x2), out2


def init_params(key):
    """Deterministic init mimicking nn.Linear (uniform in +-1/sqrt(fan_in))."""
    k1, k2, k3, k4 = jax.random.split(key, 4)
    bound1 = 1.0 / jnp.sqrt(4.0)
    # Model1: Linear(4, 4) -> stored transposed as (in, out)
    w1 = jax.random.uniform(k1, (4, 4), jnp.float32, -bound1, bound1)
    b1 = jax.random.uniform(k2, (1, 4), jnp.float32, -bound1, bound1)
    # Model2: Linear(4, 1) -> stored transposed as (in, out)
    w2 = jax.random.uniform(k3, (4, 1), jnp.float32, -bound1, bound1)
    b2 = jax.random.uniform(k4, (1, 1), jnp.float32, -bound1, bound1)
    return w1, b1, w2, b2


if __name__ == "__main__":
    key = jax.random.PRNGKey(0)
    w1, b1, w2, b2 = init_params(key)

    # Precompute the fused parameter slab ONCE (re-run only when params change).
    param_slab = make_param_slab(w1, b1, w2, b2)

    # Inputs per the reference script: x1 = ones((3,4)), x2 = full((3,4), 2)
    x1 = jnp.ones((3, 4), dtype=jnp.float32)
    x2 = jnp.full((3, 4), 2.0, dtype=jnp.float32)

    (out1, out1x2), out2 = actor_forward(x1, x2, param_slab)
    jax.block_until_ready((out1, out1x2, out2))

    # Sanity check against plain-JAX reference.
    ref1 = x1 @ w1 + b1
    ref1x2 = ref1 * 2.0
    ref2 = x2 @ w2 + b2
    assert jnp.allclose(out1, ref1, atol=1e-5)
    assert jnp.allclose(out1x2, ref1x2, atol=1e-5)
    assert jnp.allclose(out2, ref2, atol=1e-5)
    assert out1.shape == (3, 4) and out1x2.shape == (3, 4) and out2.shape == (3, 1)

    # TODO(synk): the Adam optimizers in Actor.__init__ are training state,
    # not part of forward, and are intentionally not implemented.
    print("KERNEL_OK")
</pallas_src>

<mosaic_0001>
module attributes {stable_mosaic.version = 11 : i64} {
  func.func @actor_kernel(%arg0: memref<17x128xf32, #tpu.memory_space<vmem>>, %arg1: memref<8x128xf32, #tpu.memory_space<vmem>>) attributes {dimension_semantics = [], scalar_prefetch = 0 : i64, scratch_operands = 0 : i64, tpu.core_type = #tpu.core_type<tc>} {
    %c0 = arith.constant 0 : index
    %c0_0 = arith.constant 0 : index
    %0 = vector.load %arg0[%c0, %c0_0] : memref<17x128xf32, #tpu.memory_space<vmem>>, vector<8x128xf32>
    %c8 = arith.constant 8 : index
    %c0_1 = arith.constant 0 : index
    %1 = vector.load %arg0[%c8, %c0_1] : memref<17x128xf32, #tpu.memory_space<vmem>>, vector<8x128xf32>
    %c16 = arith.constant 16 : index
    %c0_2 = arith.constant 0 : index
    %2 = vector.load %arg0[%c16, %c0_2] : memref<17x128xf32, #tpu.memory_space<vmem>>, vector<1x128xf32>
    %3 = vector.extract_strided_slice %0 {offsets = [0, 0], sizes = [8, 1], strides = [1, 1]} : vector<8x128xf32> to vector<8x1xf32>
    %4 = vector.extract_strided_slice %1 {offsets = [0, 0], sizes = [1, 128], strides = [1, 1]} : vector<8x128xf32> to vector<1x128xf32>
    %5 = vector.broadcast %3 : vector<8x1xf32> to vector<8x128xf32>
    %6 = vector.broadcast %4 : vector<1x128xf32> to vector<8x128xf32>
    %7 = arith.mulf %5, %6 : vector<8x128xf32>
    %8 = vector.extract_strided_slice %0 {offsets = [0, 1], sizes = [8, 1], strides = [1, 1]} : vector<8x128xf32> to vector<8x1xf32>
    %9 = vector.extract_strided_slice %1 {offsets = [1, 0], sizes = [1, 128], strides = [1, 1]} : vector<8x128xf32> to vector<1x128xf32>
    %10 = vector.broadcast %8 : vector<8x1xf32> to vector<8x128xf32>
    %11 = vector.broadcast %9 : vector<1x128xf32> to vector<8x128xf32>
    %12 = arith.mulf %10, %11 : vector<8x128xf32>
    %13 = arith.addf %7, %12 : vector<8x128xf32>
    %14 = vector.extract_strided_slice %0 {offsets = [0, 2], sizes = [8, 1], strides = [1, 1]} : vector<8x128xf32> to vector<8x1xf32>
    %15 = vector.extract_strided_slice %1 {offsets = [2, 0], sizes = [1, 128], strides = [1, 1]} : vector<8x128xf32> to vector<1x128xf32>
    %16 = vector.broadcast %14 : vector<8x1xf32> to vector<8x128xf32>
    %17 = vector.broadcast %15 : vector<1x128xf32> to vector<8x128xf32>
    %18 = arith.mulf %16, %17 : vector<8x128xf32>
    %19 = arith.addf %13, %18 : vector<8x128xf32>
    %20 = vector.extract_strided_slice %0 {offsets = [0, 3], sizes = [8, 1], strides = [1, 1]} : vector<8x128xf32> to vector<8x1xf32>
    %21 = vector.extract_strided_slice %1 {offsets = [3, 0], sizes = [1, 128], strides = [1, 1]} : vector<8x128xf32> to vector<1x128xf32>
    %22 = vector.broadcast %20 : vector<8x1xf32> to vector<8x128xf32>
    %23 = vector.broadcast %21 : vector<1x128xf32> to vector<8x128xf32>
    %24 = arith.mulf %22, %23 : vector<8x128xf32>
    %25 = arith.addf %19, %24 : vector<8x128xf32>
    %26 = vector.extract_strided_slice %0 {offsets = [0, 4], sizes = [8, 1], strides = [1, 1]} : vector<8x128xf32> to vector<8x1xf32>
    %27 = vector.extract_strided_slice %1 {offsets = [4, 0], sizes = [1, 128], strides = [1, 1]} : vector<8x128xf32> to vector<1x128xf32>
    %28 = vector.broadcast %26 : vector<8x1xf32> to vector<8x128xf32>
    %29 = vector.broadcast %27 : vector<1x128xf32> to vector<8x128xf32>
    %30 = arith.mulf %28, %29 : vector<8x128xf32>
    %31 = arith.addf %25, %30 : vector<8x128xf32>
    %32 = vector.extract_strided_slice %0 {offsets = [0, 5], sizes = [8, 1], strides = [1, 1]} : vector<8x128xf32> to vector<8x1xf32>
    %33 = vector.extract_strided_slice %1 {offsets = [5, 0], sizes = [1, 128], strides = [1, 1]} : vector<8x128xf32> to vector<1x128xf32>
    %34 = vector.broadcast %32 : vector<8x1xf32> to vector<8x128xf32>
    %35 = vector.broadcast %33 : vector<1x128xf32> to vector<8x128xf32>
    %36 = arith.mulf %34, %35 : vector<8x128xf32>
    %37 = arith.addf %31, %36 : vector<8x128xf32>
    %38 = vector.extract_strided_slice %0 {offsets = [0, 6], sizes = [8, 1], strides = [1, 1]} : vector<8x128xf32> to vector<8x1xf32>
    %39 = vector.extract_strided_slice %1 {offsets = [6, 0], sizes = [1, 128], strides = [1, 1]} : vector<8x128xf32> to vector<1x128xf32>
    %40 = vector.broadcast %38 : vector<8x1xf32> to vector<8x128xf32>
    %41 = vector.broadcast %39 : vector<1x128xf32> to vector<8x128xf32>
    %42 = arith.mulf %40, %41 : vector<8x128xf32>
    %43 = arith.addf %37, %42 : vector<8x128xf32>
    %44 = vector.extract_strided_slice %0 {offsets = [0, 7], sizes = [8, 1], strides = [1, 1]} : vector<8x128xf32> to vector<8x1xf32>
    %45 = vector.extract_strided_slice %1 {offsets = [7, 0], sizes = [1, 128], strides = [1, 1]} : vector<8x128xf32> to vector<1x128xf32>
    %46 = vector.broadcast %44 : vector<8x1xf32> to vector<8x128xf32>
    %47 = vector.broadcast %45 : vector<1x128xf32> to vector<8x128xf32>
    %48 = arith.mulf %46, %47 : vector<8x128xf32>
    %49 = arith.addf %43, %48 : vector<8x128xf32>
    %50 = vector.broadcast %2 : vector<1x128xf32> to vector<8x128xf32>
    %51 = arith.addf %49, %50 : vector<8x128xf32>
    %c0_3 = arith.constant 0 : index
    %c0_4 = arith.constant 0 : index
    %52 = vector.load %arg1[%c0_3, %c0_4] : memref<8x128xf32, #tpu.memory_space<vmem>>, vector<8x128xf32>
    tpu.vector_store %arg1[%c0_3, %c0_4], %51 {strides = array<i32>} : memref<8x128xf32, #tpu.memory_space<vmem>>, vector<8x128xf32>,
    return
  }
}

</mosaic_0001>

<bundles_post_ra>
// kernel: actor_forward.1
= control target key start
LH: loop header
LB: loop body
LE: loop exit
PB: predicated region body
PF: predicated region fallthrough
CT: control target
= control target key end

     0   :  { %v119_v0 = vmov 2   ;;  %v120_v1 = vmov 0   ;;  %v121_v3 = vmov 3   ;;  %v122_v4 = vmov 1   ;;  %s149_s0 = inlined_call_operand.vmem [shape: f32[17,128], index: 0, kind: input, shape index: {}]   ;;  %s150_s1 = inlined_call_operand.vmem [shape: f32[8,128], index: 1, kind: output, shape index: {}]  }
   0x1   :  { %112 = vset.pattern.permute.xlu1 %v119_v0  ;;  %110 = vset.pattern.permute.xlu0 %v120_v1  ;;  %v8_v2 = vld [vmem:[%s149_s0] sm:$0xff]  ;;  %v123_v5 = vmov 4   ;;  %v124_v6 = vmov 5   ;;  %v125_v7 = vmov 6   ;;  %v126_v8 = vmov 7   ;;  %v9_v16 = vld [vmem:[%s149_s0 + $0x8] sm:$0xff] }
   0x2   :  { %32 = vperm.xlu1 %112, %v8_v2   ;;  %13 = vperm.xlu0 %110, %v8_v2   ;;  %v16_v9 = vlaneseq  ;;  %v101_v50 = vld [vmem:[%s149_s0 + $0x10] ss:$0 sm:$0xff] }
   0x4   :  { %v17_v10 = vshrl.u32 %v16_v9, 7 }
   0x6   :  { %113 = vset.pattern.permute.xlu1 %v121_v3  ;;  %111 = vset.pattern.permute.xlu0 %v122_v4  ;;  %v18_v11 = vsub.s32 0, %v17_v10  ;;  %v27_v12 = vsub.s32 1, %v17_v10  ;;  %v37_v13 = vsub.s32 2, %v17_v10  ;;  %v47_v18 = vsub.s32 3, %v17_v10 }
   0x7   :  { %42 = vperm.xlu1 %113, %v8_v2   ;;  %22 = vperm.xlu0 %111, %v8_v2   ;;  %v57_v20 = vsub.s32 4, %v17_v10  ;;  %v67_v24 = vsub.s32 5, %v17_v10  ;;  %v77_v32 = vsub.s32 6, %v17_v10  ;;  %v87_v41 = vsub.s32 7, %v17_v10 }
   0x8   :  { %v19_v17 = vrot.slane %v9_v16, %v18_v11  ;;  %v28_v19 = vrot.slane %v9_v16, %v27_v12  ;;  %v38_v21 = vrot.slane %v9_v16, %v37_v13  ;;  %v48_v26 = vrot.slane %v9_v16, %v47_v18 }
   0x9   :  { %v58_v28 = vrot.slane %v9_v16, %v57_v20  ;;  %v68_v31 = vrot.slane %v9_v16, %v67_v24  ;;  %v78_v40 = vrot.slane %v9_v16, %v77_v32  ;;  %v88_v46 = vrot.slane %v9_v16, %v87_v41 }
   0xb   :  { %114 = vset.pattern.permute.xlu1 %v123_v5  ;;  %115 = vset.pattern.permute.xlu0 %v124_v6 }
   0xc   :  { %52 = vperm.xlu1 %114, %v8_v2   ;;  %62 = vperm.xlu0 %115, %v8_v2  }
  0x10   :  { %116 = vset.pattern.permute.xlu1 %v125_v7  ;;  %118 = vset.pattern.permute.xlu0 %v126_v8 }
  0x11   :  { %72 = vperm.xlu1 %116, %v8_v2  }
  0x15   :  { %117 = vset.pattern.permute.xlu1 %v126_v8 }
  0x16   :  { %82 = vperm.xlu1 %117, %v8_v2  }
  0x81   :  { %v33_v14 = vpop.permute.xlu1 %32  ;;  %v14_v15 = vpop.permute.xlu0 %13 }
  0x82   :  { %v20_v25 = vmul.f32 %v19_v17, %v14_v15  ;;  %v39_v29 = vmul.f32 %v38_v21, %v33_v14 }
  0x86   :  { %v43_v22 = vpop.permute.xlu1 %42  ;;  %v23_v23 = vpop.permute.xlu0 %22 }
  0x87   :  { %v29_v27 = vmul.f32 %v28_v19, %v23_v23  ;;  %v49_v33 = vmul.f32 %v48_v26, %v43_v22 }
  0x89   :  { %v30_v30 = vadd.f32 %v29_v27, %v20_v25 }
  0x8b   :  { %v40_v34 = vadd.f32 %v39_v29, %v30_v30  ;;  %v53_v35 = vpop.permute.xlu1 %52  ;;  %v63_v36 = vpop.permute.xlu0 %62 }
  0x8c   :  { %v59_v37 = vmul.f32 %v58_v28, %v53_v35  ;;  %v69_v39 = vmul.f32 %v68_v31, %v63_v36 }
  0x8d   :  { %v50_v38 = vadd.f32 %v49_v33, %v40_v34 }
  0x8f   :  { %v60_v42 = vadd.f32 %v59_v37, %v50_v38 }
  0x90   :  { %v73_v43 = vpop.permute.xlu1 %72 }
  0x91   :  { %v70_v44 = vadd.f32 %v69_v39, %v60_v42  ;;  %v79_v45 = vmul.f32 %v78_v40, %v73_v43 }
  0x93   :  { %v80_v48 = vadd.f32 %v79_v45, %v70_v44 }
  0x95   :  { %v83_v47 = vpop.permute.xlu1 %82 }
  0x96   :  { %v89_v49 = vmul.f32 %v88_v46, %v83_v47 }
  0x98   :  { %v90_v51 = vadd.f32 %v89_v49, %v80_v48 }
  0x9a   :  { %v95_v52 = vadd.f32 %v101_v50, %v90_v51 }
  0x9c   :  { %96 = vst [vmem:[%s150_s1] sm:$0xff] %v95_v52 }

</bundles_post_ra>
